<compile_context>
chip_gen: v7x
topology: tpu7x:2x2x1
jax: 0.10.0
libtpu: 0.0.40
codegen_flags: <defaults>
</compile_context>

<pallas_src>
import jax
import jax.numpy as jnp
from jax import lax
from jax.experimental import pallas as pl
from jax.experimental.pallas import tpu as pltpu

FEATURES = 32
EPS = 1e-6
_LANES = 128  # TPU vreg lane width


# ------------- Fused LN -> linear -> dropout -> +residual kernel -------------
def _make_fused_kernel(feats: int, use_dropout: bool, keep_thresh: int):
    """Kernel over a lane-packed row tile (tm, lanes), lanes = pack * feats.

    `seg_ref` is a (lanes, lanes) block-diagonal all-ones matrix: one MXU
    matmul against it yields the per-original-row (segment) sum broadcast back
    across that segment's lanes, giving LN mean/var without lane shuffles.
    """
    inv_n = 1.0 / float(feats)
    inv_nm1 = 1.0 / float(feats - 1)  # torch.std default is unbiased (N-1)

    def _ln_linear(x_ref, seg_ref, w_ref, blin_ref, alpha_ref, bias_ref):
        x = x_ref[...].astype(jnp.float32)                       # (tm, lanes)
        seg = seg_ref[...]
        mean = jnp.dot(x, seg, preferred_element_type=jnp.float32,
                       precision=lax.Precision.HIGHEST) * inv_n
        d = x - mean
        var = jnp.dot(d * d, seg, preferred_element_type=jnp.float32,
                      precision=lax.Precision.HIGHEST) * inv_nm1
        # Reference adds eps to std (not variance).
        # TODO(synk): pl.reciprocal(..., approx=True) would move this divide to
        #             the EUP; plain divide kept for interpret portability.
        inv = 1.0 / (jnp.sqrt(var) + EPS)
        normed = alpha_ref[...] * d * inv + bias_ref[...]
        # Sublayer: linear (feats -> feats), block-diagonal so it acts
        # independently on each packed segment; f32 MXU accumulation.
        y = jnp.dot(normed, w_ref[...], preferred_element_type=jnp.float32,
                    precision=lax.Precision.HIGHEST) + blin_ref[...]
        return x, y

    if not use_dropout:
        def kernel(x_ref, seg_ref, w_ref, blin_ref, alpha_ref, bias_ref, o_ref):
            x, y = _ln_linear(x_ref, seg_ref, w_ref, blin_ref, alpha_ref, bias_ref)
            o_ref[...] = x + y
    else:
        def kernel(x_ref, bits_ref, seg_ref, w_ref, blin_ref, alpha_ref,
                   bias_ref, o_ref):
            x, y = _ln_linear(x_ref, seg_ref, w_ref, blin_ref, alpha_ref, bias_ref)
            # keep element <=> bits >= keep_thresh (P[keep] ~ 1 - rate, 1/256
            # quantization).  keep_thresh is a Python int -> no captured
            # constants.  W / b_lin were pre-scaled by 1/(1-rate) outside.
            keep = bits_ref[...] >= keep_thresh
            o_ref[...] = x + jnp.where(keep, y, 0.0)

    return kernel


def _round_up(v, m):
    return ((v + m - 1) // m) * m


def residual_connection_fused(x2d, bits, w, b_lin, alpha, bias, rate, *,
                              block_rows=2048):
    """out = x2d + dropout(LayerNorm(x2d) @ w + b_lin); x2d/bits: (rows, F)."""
    rate = float(rate)
    rows, feats = x2d.shape
    use_dropout = rate > 0.0
    if use_dropout and bits is None:
        raise ValueError("dropout > 0 requires a uint8 `bits` mask array")

    # ---- lane packing: `pack` original rows per 128-lane physical row -------
    pack = _LANES // feats if (feats <= _LANES and _LANES % feats == 0) else 1
    lanes = pack * feats
    rows_pad = _round_up(rows, pack)
    if rows_pad != rows:
        x2d = jnp.pad(x2d, ((0, rows_pad - rows), (0, 0)))
        if use_dropout:
            bits = jnp.pad(bits, ((0, rows_pad - rows), (0, 0)))
    prows = rows_pad // pack
    xp = x2d.reshape(prows, lanes)                     # free row-major reshape
    bitsp = bits.reshape(prows, lanes) if use_dropout else None

    # ---- small resident operands (constant index_map -> stay in VMEM) -------
    eye = jnp.eye(pack, dtype=jnp.float32)
    w_bd = jnp.kron(eye, w.astype(jnp.float32))                  # (lanes, lanes)
    seg = jnp.kron(eye, jnp.ones((feats, feats), jnp.float32))   # segment-sum
    alpha_t = jnp.tile(alpha.reshape(1, feats).astype(jnp.float32), (1, pack))
    bias_t = jnp.tile(bias.reshape(1, feats).astype(jnp.float32), (1, pack))
    blin_t = jnp.tile(b_lin.reshape(1, feats).astype(jnp.float32), (1, pack))

    keep_thresh = 0
    if use_dropout:
        # Pre-scale the tiny weight/bias by 1/(1-p) once (legit hoist) instead
        # of multiplying every kept element in the kernel.
        scale = 1.0 / (1.0 - rate)
        w_bd = w_bd * scale
        blin_t = blin_t * scale
        # Rates within ~1/512 of 0 or 1 saturate due to uint8 quantization.
        keep_thresh = min(max(int(round(rate * 256.0)), 0), 255)

    # ---- row-tile selection --------------------------------------------------
    # Multiple of 32 packed rows (f32 needs 8 sublanes; the uint8 mask 32), and
    # at least two grid steps when possible so the "parallel" axis can shard
    # rows across both TensorCores on v7x.
    block_rows = max(32, (int(block_rows) // 32) * 32)
    if prows <= 64:
        tm = prows                       # single block == full array (exempt)
    else:
        tm = min(block_rows, _round_up((prows + 1) // 2, 32))
    grid = (pl.cdiv(prows, tm),)

    row_spec = pl.BlockSpec((tm, lanes), lambda i: (i, 0))

    def _resident(arr):
        return pl.BlockSpec(arr.shape, lambda i: (0, 0))

    in_specs = [row_spec]
    args = [xp]
    if use_dropout:
        in_specs.append(pl.BlockSpec((tm, lanes), lambda i: (i, 0)))
        args.append(bitsp)
    in_specs += [_resident(seg), _resident(w_bd), _resident(blin_t),
                 _resident(alpha_t), _resident(bias_t)]
    args += [seg, w_bd, blin_t, alpha_t, bias_t]

    out = pl.pallas_call(
        _make_fused_kernel(feats, use_dropout, keep_thresh),
        out_shape=jax.ShapeDtypeStruct((prows, lanes), jnp.float32),
        grid=grid,
        in_specs=in_specs,
        out_specs=row_spec,
        compiler_params=pltpu.CompilerParams(
            dimension_semantics=("parallel",),
            # 2048x128 f32 x/out + uint8 mask, double-buffered, plus residents
            # is < 5 MiB: fits every generation's scoped-VMEM default
            # (16 MiB v5e, 32 MiB v6e/v7x); 32 MiB leaves headroom everywhere.
            vmem_limit_bytes=32 * 1024 * 1024,
        ),
    )(*args)

    out = out.reshape(rows_pad, feats)
    if rows_pad != rows:
        out = out[:rows]
    return out


# ----------------------------- Module wrapper --------------------------------
class ResidualConnection:
    """JAX/Pallas port of the PyTorch ResidualConnection (linear sublayer)."""

    def __init__(self, features: int, dropout: float):
        self.features = features
        self.dropout_rate = float(dropout)
        # LayerNormalization params: alpha = ones(features), bias = zeros(features)
        self.alpha = jnp.ones((features,), jnp.float32)
        self.bias = jnp.zeros((features,), jnp.float32)

    def __call__(self, x, sublayer_w, sublayer_b, *, rng_key=None, block_rows=2048):
        B, S, F = x.shape
        rows = B * S
        x2 = x.reshape(rows, F)
        bits = None
        if self.dropout_rate > 0.0:
            if rng_key is None:
                raise ValueError("rng_key is required when dropout > 0 "
                                 "(reusing a fixed key would repeat the mask)")
            # Host-generated uint8 mask bits (1 B/elem), interpret-safe.
            bits = jax.random.bits(rng_key, (rows, F), dtype=jnp.uint8)
        out = residual_connection_fused(
            x2, bits, sublayer_w, sublayer_b, self.alpha, self.bias,
            self.dropout_rate, block_rows=block_rows,
        )
        return out.reshape(B, S, F)


# ------------------------------------ Demo -----------------------------------
if __name__ == "__main__":
    B, S, F = 2, 8, FEATURES
    key = jax.random.PRNGKey(0)
    kx, kw, kd = jax.random.split(key, 3)

    x = jax.random.normal(kx, (B, S, F), dtype=jnp.float32)

    # Deterministic "sublayer": linear layer features -> features.
    W = jax.random.normal(kw, (F, F), dtype=jnp.float32) / jnp.sqrt(F)
    b_lin = jnp.zeros((F,), jnp.float32)

    def ref_ln_linear(xin):
        xf = xin.astype(jnp.float32)
        mean = xf.mean(axis=-1, keepdims=True)
        std = jnp.std(xf, axis=-1, ddof=1, keepdims=True)  # unbiased, like torch.std
        normed = (xf - mean) / (std + EPS)                  # alpha=1, bias=0
        return normed @ W + b_lin

    # --- deterministic check (dropout = 0.0) vs a pure-JAX reference ---------
    rc_eval = ResidualConnection(features=F, dropout=0.0)
    out_eval = rc_eval(x, W, b_lin)
    jax.block_until_ready(out_eval)
    ref_eval = x + ref_ln_linear(x)
    assert bool(jnp.allclose(out_eval, ref_eval, rtol=1e-4, atol=1e-4)), \
        "fused kernel mismatch vs reference (dropout=0)"

    # --- training path (dropout = 0.1), exact check with the same mask -------
    rate = 0.1
    rc = ResidualConnection(features=F, dropout=rate)
    out = rc(x, W, b_lin, rng_key=kd)
    jax.block_until_ready(out)
    assert out.shape == (B, S, F) and out.dtype == jnp.float32
    assert bool(jnp.all(jnp.isfinite(out)))

    bits_ref = jax.random.bits(kd, (B * S, F), dtype=jnp.uint8).reshape(B, S, F)
    keep_ref = bits_ref >= min(max(int(round(rate * 256.0)), 0), 255)
    expected = x + jnp.where(keep_ref, ref_ln_linear(x) / (1.0 - rate), 0.0)
    assert bool(jnp.allclose(out, expected, rtol=1e-4, atol=1e-4)), \
        "fused kernel mismatch vs reference (dropout=0.1)"

    print("KERNEL_OK")
</pallas_src>

<mosaic_0001>
module attributes {stable_mosaic.version = 11 : i64} {
  func.func @kernel(%arg0: i32, %arg1: memref<4x128xf32, #tpu.memory_space<vmem>>, %arg2: memref<128x128xf32, #tpu.memory_space<vmem>>, %arg3: memref<128x128xf32, #tpu.memory_space<vmem>>, %arg4: memref<1x128xf32, #tpu.memory_space<vmem>>, %arg5: memref<1x128xf32, #tpu.memory_space<vmem>>, %arg6: memref<1x128xf32, #tpu.memory_space<vmem>>, %arg7: memref<4x128xf32, #tpu.memory_space<vmem>>) attributes {dimension_semantics = [#tpu.dimension_semantics<parallel>], iteration_bounds = array<i64: 1>, scalar_prefetch = 0 : i64, scratch_operands = 0 : i64, tpu.core_type = #tpu.core_type<tc>, window_params = [{transform_indices = @transform_0, window_bounds = array<i64: 4, 128>}, {pipeline_mode = #tpu.pipeline_mode<synchronous>, transform_indices = @transform_1, window_bounds = array<i64: 128, 128>}, {pipeline_mode = #tpu.pipeline_mode<synchronous>, transform_indices = @transform_2, window_bounds = array<i64: 128, 128>}, {pipeline_mode = #tpu.pipeline_mode<synchronous>, transform_indices = @transform_3, window_bounds = array<i64: 1, 128>}, {pipeline_mode = #tpu.pipeline_mode<synchronous>, transform_indices = @transform_4, window_bounds = array<i64: 1, 128>}, {pipeline_mode = #tpu.pipeline_mode<synchronous>, transform_indices = @transform_5, window_bounds = array<i64: 1, 128>}, {transform_indices = @transform_6, window_bounds = array<i64: 4, 128>}]} {
    %c0 = arith.constant 0 : index
    %c0_0 = arith.constant 0 : index
    %0 = vector.load %arg1[%c0, %c0_0] : memref<4x128xf32, #tpu.memory_space<vmem>>, vector<4x128xf32>
    %c0_1 = arith.constant 0 : index
    %c0_2 = arith.constant 0 : index
    %1 = vector.load %arg2[%c0_1, %c0_2] : memref<128x128xf32, #tpu.memory_space<vmem>>, vector<128x128xf32>
    %cst = arith.constant dense<0.000000e+00> : vector<4x128xf32>
    %2 = tpu.matmul %0, %1, %cst {dimension_numbers = #tpu.dot_dimension_numbers<[1], [0], [0], [1], [0, 0, 1, 1], [], []>, precision = #tpu.contract_precision<fp32>} : vector<4x128xf32>, vector<128x128xf32>, vector<4x128xf32> -> vector<4x128xf32>
    %cst_3 = arith.constant 3.125000e-02 : f32
    %3 = vector.broadcast %cst_3 : f32 to vector<4x128xf32>
    %4 = arith.mulf %2, %3 : vector<4x128xf32>
    %5 = arith.subf %0, %4 : vector<4x128xf32>
    %6 = arith.mulf %5, %5 : vector<4x128xf32>
    %cst_4 = arith.constant dense<0.000000e+00> : vector<4x128xf32>
    %7 = tpu.matmul %6, %1, %cst_4 {dimension_numbers = #tpu.dot_dimension_numbers<[1], [0], [0], [1], [0, 0, 1, 1], [], []>, precision = #tpu.contract_precision<fp32>} : vector<4x128xf32>, vector<128x128xf32>, vector<4x128xf32> -> vector<4x128xf32>
    %cst_5 = arith.constant 0.0322580636 : f32
    %8 = vector.broadcast %cst_5 : f32 to vector<4x128xf32>
    %9 = arith.mulf %7, %8 : vector<4x128xf32>
    %10 = math.sqrt %9 : vector<4x128xf32>
    %cst_6 = arith.constant 9.99999997E-7 : f32
    %11 = vector.broadcast %cst_6 : f32 to vector<4x128xf32>
    %12 = arith.addf %10, %11 : vector<4x128xf32>
    %cst_7 = arith.constant 1.000000e+00 : f32
    %13 = vector.broadcast %cst_7 : f32 to vector<4x128xf32>
    %14 = arith.divf %13, %12 : vector<4x128xf32>
    %c0_8 = arith.constant 0 : index
    %c0_9 = arith.constant 0 : index
    %15 = vector.load %arg5[%c0_8, %c0_9] : memref<1x128xf32, #tpu.memory_space<vmem>>, vector<1x128xf32>
    %16 = vector.broadcast %15 : vector<1x128xf32> to vector<4x128xf32>
    %17 = arith.mulf %16, %5 : vector<4x128xf32>
    %18 = arith.mulf %17, %14 : vector<4x128xf32>
    %c0_10 = arith.constant 0 : index
    %c0_11 = arith.constant 0 : index
    %19 = vector.load %arg6[%c0_10, %c0_11] : memref<1x128xf32, #tpu.memory_space<vmem>>, vector<1x128xf32>
    %20 = vector.broadcast %19 : vector<1x128xf32> to vector<4x128xf32>
    %21 = arith.addf %18, %20 : vector<4x128xf32>
    %c0_12 = arith.constant 0 : index
    %c0_13 = arith.constant 0 : index
    %22 = vector.load %arg3[%c0_12, %c0_13] : memref<128x128xf32, #tpu.memory_space<vmem>>, vector<128x128xf32>
    %cst_14 = arith.constant dense<0.000000e+00> : vector<4x128xf32>
    %23 = tpu.matmul %21, %22, %cst_14 {dimension_numbers = #tpu.dot_dimension_numbers<[1], [0], [0], [1], [0, 0, 1, 1], [], []>, precision = #tpu.contract_precision<fp32>} : vector<4x128xf32>, vector<128x128xf32>, vector<4x128xf32> -> vector<4x128xf32>
    %c0_15 = arith.constant 0 : index
    %c0_16 = arith.constant 0 : index
    %24 = vector.load %arg4[%c0_15, %c0_16] : memref<1x128xf32, #tpu.memory_space<vmem>>, vector<1x128xf32>
    %25 = vector.broadcast %24 : vector<1x128xf32> to vector<4x128xf32>
    %26 = arith.addf %23, %25 : vector<4x128xf32>
    %27 = arith.addf %0, %26 : vector<4x128xf32>
    %c0_17 = arith.constant 0 : index
    %c0_18 = arith.constant 0 : index
    %28 = vector.load %arg7[%c0_17, %c0_18] : memref<4x128xf32, #tpu.memory_space<vmem>>, vector<4x128xf32>
    tpu.vector_store %arg7[%c0_17, %c0_18], %27 {strides = array<i32>} : memref<4x128xf32, #tpu.memory_space<vmem>>, vector<4x128xf32>,
    return
  }
  func.func @transform_0(%arg0: i32) -> (i32, i32) {
    %c0_i32 = arith.constant 0 : i32
    %c0_i32_0 = arith.constant 0 : i32
    return %arg0, %c0_i32 : i32, i32
  }
  func.func @transform_1(%arg0: i32) -> (i32, i32) {
    %c0_i32 = arith.constant 0 : i32
    %c0_i32_0 = arith.constant 0 : i32
    %c0_i32_1 = arith.constant 0 : i32
    return %c0_i32, %c0_i32_0 : i32, i32
  }
  func.func @transform_2(%arg0: i32) -> (i32, i32) {
    %c0_i32 = arith.constant 0 : i32
    %c0_i32_0 = arith.constant 0 : i32
    %c0_i32_1 = arith.constant 0 : i32
    return %c0_i32, %c0_i32_0 : i32, i32
  }
  func.func @transform_3(%arg0: i32) -> (i32, i32) {
    %c0_i32 = arith.constant 0 : i32
    %c0_i32_0 = arith.constant 0 : i32
    %c0_i32_1 = arith.constant 0 : i32
    return %c0_i32, %c0_i32_0 : i32, i32
  }
  func.func @transform_4(%arg0: i32) -> (i32, i32) {
    %c0_i32 = arith.constant 0 : i32
    %c0_i32_0 = arith.constant 0 : i32
    %c0_i32_1 = arith.constant 0 : i32
    return %c0_i32, %c0_i32_0 : i32, i32
  }
  func.func @transform_5(%arg0: i32) -> (i32, i32) {
    %c0_i32 = arith.constant 0 : i32
    %c0_i32_0 = arith.constant 0 : i32
    %c0_i32_1 = arith.constant 0 : i32
    return %c0_i32, %c0_i32_0 : i32, i32
  }
  func.func @transform_6(%arg0: i32) -> (i32, i32) {
    %c0_i32 = arith.constant 0 : i32
    %c0_i32_0 = arith.constant 0 : i32
    return %arg0, %c0_i32 : i32, i32
  }
}

</mosaic_0001>

<bundles_post_ra>
// kernel: tpu_custom_call.1
= control target key start
LH: loop header
LB: loop body
LE: loop exit
PB: predicated region body
PF: predicated region fallthrough
CT: control target
= control target key end

     0   :  { %11 = vsyncpa [#allocation3], 0  ;;  %s4389_s0 = inlined_call_operand.hbm [shape: f32[4,128], index: 0, kind: input, shape index: {}]   ;;  %s4390_s1 = inlined_call_operand.hbm [shape: f32[128,128], index: 1, kind: input, shape index: {}]   ;;  %s4391_s2 = inlined_call_operand.hbm [shape: f32[128,128], index: 2, kind: input, shape index: {}]   ;;  %s4392_s3 = inlined_call_operand.vmem [shape: f32[1,128], index: 3, kind: input, shape index: {}]   ;;  %s4393_s4 = inlined_call_operand.vmem [shape: f32[1,128], index: 4, kind: input, shape index: {}]   ;;  %s4394_s5 = inlined_call_operand.vmem [shape: f32[1,128], index: 5, kind: input, shape index: {}]   ;;  %s4395_s6 = inlined_call_operand.hbm [shape: f32[4,128], index: 6, kind: output, shape index: {}]  }
   0x1   :  { %12 = vsyncpa [#allocation6], 0 }
   0x2   :  { %13 = vsyncpa [#allocation4], 0  ;;  %s3574_s21 = smov [#allocation5]   ;;  %s3480_s25 = scalar_lea.hbm %s4390_s1, 2048 }
   0x3   :  { %s29_s22 = sshll.u32 %s3574_s21, 4  ;;  %p3481_p0 = scmp.ne.s32.totalorder %s4390_s1, %s3480_s25  ;;  %s30_s22 = int_to_ptr.vmem [resolvable:$true] %s29_s22 }
   0x4   :  { %p3484_p1 = scmp.lt.u32.totalorder %s3480_s25, %s4390_s1 }
   0x6   :  { %p3486_p2 = pnand %p3484_p1, %p3481_p0 }
   0x8   :  { %3489 = shalt.err (!%p3486_p2)
}
   0x9   :  { %s3490_s30 = scalar_lea.vmem %s30_s22, 2048  ;;  %p3495_p4 = scmp.lt.s32.totalorder %s30_s22, %s30_s22 }
   0xa   :  { %p3491_p3 = scmp.ne.s32.totalorder %s30_s22, %s3490_s30  ;;  %p3496_p5 = scmp.lt.s32.totalorder %s3490_s30, %s3490_s30 }
   0xc   :  { %p3497_p6 = por %p3496_p5, %p3495_p4 }
   0xe   :  { %p3498_p7 = pnand %p3497_p6, %p3491_p3 }
  0x10   :  { %3501 = shalt.err (!%p3498_p7)
}
  0x11   :  { %s3575_s7 = smov 128   ;;  %s3576_s8 = smov 8  }
  0x12   :  { %35 = dma.hbm_to_vmem [thread:$0]  %s4390_s1, 2048, %s30_s22, [#allocation6], %s3575_s7, %s3575_s7, %s3576_s8  }
  0x13   :  { %s3577_s11 = smov [#allocation2]   ;;  %s3578_s13 = smov [#allocation7]  }
  0x14   :  { %s20_s12 = sshll.u32 %s3577_s11, 4  ;;  %s41_s14 = sshll.u32 %s3578_s13, 4  ;;  %s21_s12 = int_to_ptr.vmem [resolvable:$true] %s20_s12  ;;  %s42_s14 = int_to_ptr.vmem [resolvable:$true] %s41_s14 }
  0x15   :  { %s3502_s17 = scalar_lea.hbm %s4389_s0, 64 }
  0x16   :  { %p3503_p8 = scmp.ne.s32.totalorder %s4389_s0, %s3502_s17  ;;  %p3506_p9 = scmp.lt.u32.totalorder %s3502_s17, %s4389_s0 }
  0x18   :  { %p3508_p10 = pnand %p3506_p9, %p3503_p8 }
  0x1a   :  { %3511 = shalt.err (!%p3508_p10)
}
  0x1b   :  { %s3512_s1 = scalar_lea.vmem %s21_s12, 64  ;;  %p3517_p12 = scmp.lt.s32.totalorder %s21_s12, %s21_s12 }
  0x1c   :  { %p3513_p11 = scmp.ne.s32.totalorder %s21_s12, %s3512_s1  ;;  %p3518_p13 = scmp.lt.s32.totalorder %s3512_s1, %s3512_s1 }
  0x1e   :  { %p3519_p0 = por %p3518_p13, %p3517_p12 }
  0x20   :  { %p3520_p1 = pnand %p3519_p0, %p3513_p11 }
  0x22   :  { %3523 = shalt.err (!%p3520_p1)
}
  0x23   :  { %23 = dma.hbm_to_vmem [thread:$0]  %s4389_s0, 64, %s21_s12, [#allocation3]  }
  0x24   :  { %s3524_s26 = scalar_lea.hbm %s4391_s2, 2048 }
  0x25   :  { %p3525_p2 = scmp.ne.s32.totalorder %s4391_s2, %s3524_s26  ;;  %p3528_p3 = scmp.lt.u32.totalorder %s3524_s26, %s4391_s2 }
  0x27   :  { %p3530_p4 = pnand %p3528_p3, %p3525_p2 }
  0x29   :  { %3533 = shalt.err (!%p3530_p4)
}
  0x2a   :  { %s3534_s9 = scalar_lea.vmem %s42_s14, 2048  ;;  %p3539_p6 = scmp.lt.s32.totalorder %s42_s14, %s42_s14 }
  0x2b   :  { %p3535_p5 = scmp.ne.s32.totalorder %s42_s14, %s3534_s9  ;;  %p3540_p7 = scmp.lt.s32.totalorder %s3534_s9, %s3534_s9 }
  0x2d   :  { %p3541_p8 = por %p3540_p7, %p3539_p6 }
  0x2f   :  { %p3542_p9 = pnand %p3541_p8, %p3535_p5 }
  0x31   :  { %3545 = shalt.err (!%p3542_p9)
}
  0x32   :  { %47 = dma.hbm_to_vmem [thread:$0]  %s4391_s2, 2048, %s42_s14, [#allocation6], %s3575_s7, %s3575_s7, %s3576_s8  }
  0x33   :  { %3568 = dma.done.wait [#allocation3], 64  }
  0x34   :  { %3569 = vsyncadd [#allocation3], 4294967232 }
  0x35   :  { %3570 = dma.done.wait [#allocation6], 4096  }
  0x36   :  { %3571 = vsyncadd [#allocation6], 4294963200  ;;  %v3579_v0 = vmov 0.0|0.0   ;;  %vm3580_vm0 = vmmov 0   ;;  %v3581_v1 = vmov 0.0   ;;  %v64_v2 = vld [vmem:[#allocation5] sm:$0xff] }
  0x37   :  { %3014 = vmatprep.subr.bf16.mxu0 %v3579_v0  ;;  %2416 = vmatprep.mubr.msk.f32.mxu0 %vm3580_vm0, %v3581_v1  ;;  %v65_v3 = vld [vmem:[#allocation5 + $0x8] sm:$0xff]  ;;  %v66_v4 = vld [vmem:[#allocation5 + $0x10] sm:$0xff]  ;;  %v81_v5 = vand.u32 4294901760, %v64_v2  ;;  %v67_v7 = vld [vmem:[#allocation5 + $0x18] sm:$0xff]  ;;  %s3582_s12 = smov [#allocation8]  }
  0x38   :  { %3158 = vmatprep.subr.bf16.mxu1 %v3579_v0  ;;  %2626 = vmatprep.mubr.msk.f32.mxu1 %vm3580_vm0, %v3581_v1  ;;  %v84_v6 = vand.u32 4294901760, %v65_v3  ;;  %v87_v8 = vand.u32 4294901760, %v66_v4  ;;  %v90_v9 = vand.u32 4294901760, %v67_v7  ;;  %v68_v10 = vld [vmem:[#allocation5 + $0x20] sm:$0xff]  ;;  %v69_v11 = vld [vmem:[#allocation5 + $0x28] sm:$0xff]  ;;  %v70_v16 = vld [vmem:[#allocation5 + $0x30] sm:$0xff] }
  0x39   :  { %v93_v14 = vand.u32 4294901760, %v68_v10  ;;  %v96_v15 = vand.u32 4294901760, %v69_v11  ;;  %v71_v17 = vld [vmem:[#allocation5 + $0x38] sm:$0xff]  ;;  %v99_v19 = vand.u32 4294901760, %v70_v16  ;;  %v72_v21 = vld [vmem:[#allocation5 + $0x40] sm:$0xff]  ;;  %v73_v23 = vld [vmem:[#allocation5 + $0x48] sm:$0xff]  ;;  %v3688_v34 = vsub.f32 %v64_v2, %v81_v5 }
  0x3a   :  { %v3666_v12 = vpack.c.bf16 %v84_v6, %v81_v5  ;;  %v3669_v13 = vpack.c.bf16 %v90_v9, %v87_v8  ;;  %v102_v20 = vand.u32 4294901760, %v71_v17  ;;  %v3677_v22 = vld [vmem:[#allocation2] sm:$0xf]  ;;  %v74_v24 = vld [vmem:[#allocation5 + $0x50] sm:$0xff]  ;;  %v76_v26 = vld [vmem:[#allocation5 + $0x60] sm:$0xff]  ;;  %v105_v27 = vand.u32 4294901760, %v72_v21 }
  0x3b   :  { %v3675_v18 = vpack.c.bf16 %v96_v15, %v93_v14  ;;  %v75_v25 = vld [vmem:[#allocation5 + $0x58] sm:$0xff]  ;;  %v77_v28 = vld [vmem:[#allocation5 + $0x68] sm:$0xff]  ;;  %v78_v29 = vld [vmem:[#allocation5 + $0x70] sm:$0xff]  ;;  %v3683_v31 = vand.u32 4294901760, %v3677_v22  ;;  %v108_v33 = vand.u32 4294901760, %v73_v23  ;;  %v3690_v35 = vsub.f32 %v65_v3, %v84_v6  ;;  %s2065_s13 = sshll.u32 %s3582_s12, 4  ;;  %s2066_s13 = int_to_ptr.vmem [resolvable:$true] %s2065_s13 }
  0x3c   :  { %3016 = vmatpush3.bf16.msra.mxu0 %v3666_v12  ;;  %3160 = vmatpush3.bf16.msra.mxu1 %v3666_v12  ;;  %v79_v30 = vld [vmem:[#allocation5 + $0x78] sm:$0xff]  ;;  %v3686_v32 = vpack.c.bf16 %v102_v20, %v99_v19  ;;  %v111_v36 = vand.u32 4294901760, %v74_v24  ;;  %v114_v37 = vand.u32 4294901760, %v75_v25  ;;  %v117_v38 = vand.u32 4294901760, %v76_v26  ;;  %p3551_p11 = scmp.lt.s32.totalorder %s2066_s13, %s2066_s13 }
  0x3d   :  { %3017 = vmatprep.subr.bf16.mxu0 %v3579_v0  ;;  %3161 = vmatprep.subr.bf16.mxu1 %v3579_v0  ;;  %v120_v39 = vand.u32 4294901760, %v77_v28  ;;  %v123_v40 = vand.u32 4294901760, %v78_v29  ;;  %v126_v41 = vand.u32 4294901760, %v79_v30  ;;  %v3697_v42 = vsub.f32 %v3677_v22, %v3683_v31 }
  0x3e   :  { %v3699_v43 = vsub.f32 %v66_v4, %v87_v8  ;;  %v3702_v44 = vpack.c.bf16 %v108_v33, %v105_v27  ;;  %v174_v45 = vand.u32 4294901760, %v3688_v34  ;;  %v181_v46 = vand.u32 4294901760, %v3690_v35 }
  0x3f   :  { %v3706_v47 = vsub.f32 %v67_v7, %v90_v9  ;;  %v3710_v48 = vsub.f32 %v68_v10, %v93_v14  ;;  %v3713_v49 = vpack.c.bf16 %v114_v37, %v111_v36  ;;  %v3715_v50 = vpack.c.bf16 %v120_v39, %v117_v38 }
  0x40   :  { %3019 = vmatpush3.bf16.msra.mxu0 %v3669_v13  ;;  %3163 = vmatpush3.bf16.msra.mxu1 %v3669_v13  ;;  %v3717_v51 = vpack.c.bf16 %v126_v41, %v123_v40  ;;  %v163_v52 = vand.u32 4294901760, %v3697_v42  ;;  %v188_v53 = vand.u32 4294901760, %v3699_v43  ;;  %v3721_v54 = vsub.f32 %v69_v11, %v96_v15 }
  0x41   :  { %3020 = vmatprep.subr.bf16.mxu0 %v3579_v0  ;;  %3164 = vmatprep.subr.bf16.mxu1 %v3579_v0  ;;  %v3723_v55 = vsub.f32 %v70_v16, %v99_v19  ;;  %v175_v56 = vsub.f32 %v3688_v34, %v174_v45  ;;  %v182_v57 = vsub.f32 %v3690_v35, %v181_v46  ;;  %v195_v58 = vand.u32 4294901760, %v3706_v47 }
  0x42   :  { %v3729_v59 = vsub.f32 %v71_v17, %v102_v20  ;;  %v202_v60 = vand.u32 4294901760, %v3710_v48  ;;  %v3734_v61 = vsub.f32 %v72_v21, %v105_v27  ;;  %v3736_v62 = vsub.f32 %v73_v23, %v108_v33 }
  0x43   :  { %v3738_v63 = vsub.f32 %v74_v24, %v111_v36  ;;  %v3741_v2 = vsub.f32 %v75_v25, %v114_v37  ;;  %v3743_v3 = vsub.f32 %v76_v26, %v117_v38  ;;  %v3745_v4 = vsub.f32 %v77_v28, %v120_v39 }
  0x44   :  { %3022 = vmatpush3.bf16.msra.mxu0 %v3675_v18  ;;  %3166 = vmatpush3.bf16.msra.mxu1 %v3675_v18  ;;  %v3747_v5 = vsub.f32 %v78_v29, %v123_v40  ;;  %v164_v6 = vsub.f32 %v3697_v42, %v163_v52  ;;  %v189_v7 = vsub.f32 %v3699_v43, %v188_v53  ;;  %v209_v8 = vand.u32 4294901760, %v3721_v54 }
  0x45   :  { %3023 = vmatprep.subr.bf16.mxu0 %v3579_v0  ;;  %3167 = vmatprep.subr.bf16.mxu1 %v3579_v0  ;;  %v3754_v9 = vsub.f32 %v79_v30, %v126_v41  ;;  %v176_v10 = vand.u32 4294901760, %v175_v56  ;;  %v183_v11 = vand.u32 4294901760, %v182_v57  ;;  %v196_v14 = vsub.f32 %v3706_v47, %v195_v58 }
  0x46   :  { %v216_v15 = vand.u32 4294901760, %v3723_v55  ;;  %v223_v16 = vand.u32 4294901760, %v3729_v59  ;;  %v230_v17 = vand.u32 4294901760, %v3734_v61  ;;  %v237_v19 = vand.u32 4294901760, %v3736_v62 }
  0x47   :  { %v244_v20 = vand.u32 4294901760, %v3738_v63  ;;  %v251_v21 = vand.u32 4294901760, %v3741_v2  ;;  %v258_v23 = vand.u32 4294901760, %v3743_v3  ;;  %v265_v24 = vand.u32 4294901760, %v3745_v4 }
  0x48   :  { %3025 = vmatpush3.bf16.msra.mxu0 %v3686_v32  ;;  %3169 = vmatpush3.bf16.msra.mxu1 %v3686_v32  ;;  %v272_v25 = vand.u32 4294901760, %v3747_v5  ;;  %v279_v26 = vand.u32 4294901760, %v3754_v9  ;;  %v3771_v27 = vpack.c.bf16 %v181_v46, %v174_v45  ;;  %v3773_v28 = vpack.c.bf16 %v195_v58, %v188_v53 }
  0x49   :  { %3026 = vmatprep.subr.bf16.mxu0 %v3579_v0  ;;  %3170 = vmatprep.subr.bf16.mxu1 %v3579_v0  ;;  %v3775_v29 = vpack.c.bf16 %v209_v8, %v202_v60  ;;  %v3778_v30 = vpack.c.bf16 %v223_v16, %v216_v15  ;;  %v3780_v33 = vpack.c.bf16 %v237_v19, %v230_v17  ;;  %v165_v39 = vand.u32 4294901760, %v164_v6 }
  0x4a   :  { %v3782_v36 = vpack.c.bf16 %v251_v21, %v244_v20  ;;  %v3784_v37 = vpack.c.bf16 %v265_v24, %v258_v23  ;;  %v3787_v38 = vpack.c.bf16 %v279_v26, %v272_v25  ;;  %v203_v40 = vsub.f32 %v3710_v48, %v202_v60 }
  0x4b   :  { %v3793_v41 = vpack.c.bf16 %v183_v11, %v176_v10  ;;  %v190_v45 = vand.u32 4294901760, %v189_v7  ;;  %v197_v46 = vand.u32 4294901760, %v196_v14  ;;  %v210_v53 = vsub.f32 %v3721_v54, %v209_v8 }
  0x4c   :  { %3028 = vmatpush3.bf16.msra.mxu0 %v3702_v44  ;;  %3172 = vmatpush3.bf16.msra.mxu1 %v3702_v44  ;;  %v217_v56 = vsub.f32 %v3723_v55, %v216_v15  ;;  %v204_v58 = vand.u32 4294901760, %v203_v40  ;;  %v224_v6 = vsub.f32 %v3729_v59, %v223_v16  ;;  %v231_v11 = vsub.f32 %v3734_v61, %v230_v17 }
  0x4d   :  { %3029 = vmatprep.subr.bf16.mxu0 %v3579_v0  ;;  %3173 = vmatprep.subr.bf16.mxu1 %v3579_v0  ;;  %v3801_v57 = vpack.c.bf16 %v197_v46, %v190_v45  ;;  %v211_v60 = vand.u32 4294901760, %v210_v53  ;;  %v238_v14 = vsub.f32 %v3736_v62, %v237_v19  ;;  %v245_v15 = vsub.f32 %v3738_v63, %v244_v20 }
  0x4e   :  { %v218_v7 = vand.u32 4294901760, %v217_v56  ;;  %v225_v10 = vand.u32 4294901760, %v224_v6  ;;  %v252_v45 = vsub.f32 %v3741_v2, %v251_v21  ;;  %v259_v46 = vsub.f32 %v3743_v3, %v258_v23 }
  0x4f   :  { %v3808_v8 = vpack.c.bf16 %v211_v60, %v204_v58  ;;  %v239_v40 = vand.u32 4294901760, %v238_v14  ;;  %v246_v19 = vand.u32 4294901760, %v245_v15  ;;  %v266_v20 = vsub.f32 %v3745_v4, %v265_v24 }
  0x50   :  { %3031 = vmatpush3.bf16.msra.mxu0 %v3713_v49  ;;  %3175 = vmatpush3.bf16.msra.mxu1 %v3713_v49  ;;  %v3815_v16 = vpack.c.bf16 %v225_v10, %v218_v7  ;;  %v253_v53 = vand.u32 4294901760, %v252_v45  ;;  %v273_v56 = vsub.f32 %v3747_v5, %v272_v25  ;;  %v260_v21 = vand.u32 4294901760, %v259_v46  ;;  %v4104_v45 = vld [vmem:[#allocation7 + $0x30] sm:$0xff]  ;;  %v4106_v46 = vld [vmem:[#allocation7 + $0x38] sm:$0xff] }
  0x51   :  { %3032 = vmatprep.subr.bf16.mxu0 %v3579_v0  ;;  %3176 = vmatprep.subr.bf16.mxu1 %v3579_v0  ;;  %v267_v60 = vand.u32 4294901760, %v266_v20  ;;  %v280_v23 = vsub.f32 %v3754_v9, %v279_v26  ;;  %v3842_v26 = vpack.c.bf16 %v3690_v35, %v3688_v34  ;;  %v3849_v10 = vpack.c.bf16 %v3706_v47, %v3699_v43 }
  0x52   :  { %v3827_v58 = vpack.c.bf16 %v253_v53, %v246_v19  ;;  %v274_v7 = vand.u32 4294901760, %v273_v56  ;;  %v3857_v34 = vpack.c.bf16 %v3721_v54, %v3710_v48  ;;  %v3863_v35 = vpack.c.bf16 %v3729_v59, %v3723_v55 }
  0x53   :  { %v3832_v6 = vpack.c.bf16 %v267_v60, %v260_v21  ;;  %v281_v24 = vand.u32 4294901760, %v280_v23  ;;  %v3869_v43 = vpack.c.bf16 %v3736_v62, %v3734_v61  ;;  %v3875_v47 = vpack.c.bf16 %v3741_v2, %v3738_v63 }
  0x54   :  { %3034 = vmatpush3.bf16.msra.mxu0 %v3715_v50  ;;  %3178 = vmatpush3.bf16.msra.mxu1 %v3715_v50  ;;  %v3881_v48 = vpack.c.bf16 %v3745_v4, %v3743_v3  ;;  %v3887_v54 = vpack.c.bf16 %v3754_v9, %v3747_v5  ;;  %v1435_v53 = vand.u32 4294901760, %v4104_v45  ;;  %v1438_v20 = vand.u32 4294901760, %v4106_v46 }
  0x55   :  { %3035 = vmatprep.subr.bf16.mxu0 %v3579_v0  ;;  %3179 = vmatprep.subr.bf16.mxu1 %v3579_v0  ;;  %v3836_v25 = vpack.c.bf16 %v281_v24, %v274_v7  ;;  %v4129_v24 = vld [vmem:[#allocation7 + $0x40] sm:$0xff] }
  0x56   :  { %v4116_v60 = vsub.f32 %v4104_v45, %v1435_v53  ;;  %v4121_v23 = vsub.f32 %v4106_v46, %v1438_v20 }
  0x58   :  { %3037 = vmatpush3.bf16.msra.mxu0 %v3717_v51  ;;  %3181 = vmatpush3.bf16.msra.mxu1 %v3717_v51 }
  0x59   :  { %3038 = vmatprep.subr.bf16.mxu0 %v3579_v0  ;;  %3182 = vmatprep.subr.bf16.mxu1 %v3579_v0 }
  0x5b   :  { %2417 = vmatmul.mubr.f32.vlgmr.msra.gmra.mrb[0].mxu0 %v165_v39  ;;  %v232_v39 = vand.u32 4294901760, %v231_v11 }
  0x5c   :  { %3040 = vmatpush3.bf16.msra.mxu0 %v3793_v41  ;;  %2451 = vmatprep.mubr.msk.f32.mxu0 %vm3580_vm0, %v3581_v1 }
  0x5d   :  { %3041 = vmatprep.subr.bf16.mxu0 %v3579_v0  ;;  %v3821_v17 = vpack.c.bf16 %v239_v40, %v232_v39 }
  0x60   :  { %3043 = vmatpush3.bf16.msra.mxu0 %v3801_v57 }
  0x61   :  { %3044 = vmatprep.subr.bf16.mxu0 %v3579_v0 }
  0x64   :  { %3046 = vmatpush3.bf16.msra.mxu0 %v3808_v8 }
  0x65   :  { %3047 = vmatprep.subr.bf16.mxu0 %v3579_v0 }
  0x68   :  { %3049 = vmatpush3.bf16.msra.mxu0 %v3815_v16 }
  0x69   :  { %3050 = vmatprep.subr.bf16.mxu0 %v3579_v0 }
  0x6c   :  { %3052 = vmatpush3.bf16.msra.mxu0 %v3821_v17 }
  0x6d   :  { %3053 = vmatprep.subr.bf16.mxu0 %v3579_v0 }
  0x70   :  { %3055 = vmatpush3.bf16.msra.mxu0 %v3827_v58 }
  0x71   :  { %3056 = vmatprep.subr.bf16.mxu0 %v3579_v0 }
  0x74   :  { %3058 = vmatpush3.bf16.msra.mxu0 %v3832_v6 }
  0x75   :  { %3059 = vmatprep.subr.bf16.mxu0 %v3579_v0 }
  0x78   :  { %3061 = vmatpush3.bf16.msra.mxu0 %v3836_v25 }
  0x79   :  { %3062 = vmatprep.subr.bf16.mxu0 %v3579_v0 }
  0x7b   :  { %2452 = vmatmul.mubr.f32.vlgmr.msra.gmra.mrb[0].mxu0 %v3683_v31 }
  0x7c   :  { %3064 = vmatpush3.bf16.msra.mxu0 %v3842_v26  ;;  %2486 = vmatprep.mubr.msk.f32.mxu0 %vm3580_vm0, %v3581_v1 }
  0x7d   :  { %3065 = vmatprep.subr.bf16.mxu0 %v3579_v0 }
  0x80   :  { %3067 = vmatpush3.bf16.msra.mxu0 %v3849_v10 }
  0x81   :  { %3068 = vmatprep.subr.bf16.mxu0 %v3579_v0 }
  0x84   :  { %3070 = vmatpush3.bf16.msra.mxu0 %v3857_v34 }
  0x85   :  { %3071 = vmatprep.subr.bf16.mxu0 %v3579_v0 }
  0x88   :  { %3073 = vmatpush3.bf16.msra.mxu0 %v3863_v35 }
  0x89   :  { %3074 = vmatprep.subr.bf16.mxu0 %v3579_v0 }
  0x8c   :  { %3076 = vmatpush3.bf16.msra.mxu0 %v3869_v43 }
  0x8d   :  { %3077 = vmatprep.subr.bf16.mxu0 %v3579_v0 }
  0x90   :  { %3079 = vmatpush3.bf16.msra.mxu0 %v3875_v47 }
  0x91   :  { %3080 = vmatprep.subr.bf16.mxu0 %v3579_v0 }
  0x94   :  { %3082 = vmatpush3.bf16.msra.mxu0 %v3881_v48 }
  0x95   :  { %3083 = vmatprep.subr.bf16.mxu0 %v3579_v0 }
  0x98   :  { %3085 = vmatpush3.bf16.msra.mxu0 %v3887_v54 }
  0x99   :  { %3086 = vmatprep.subr.bf16.mxu0 %v3579_v0 }
  0x9b   :  { %2487 = vmatmul.mubr.f32.vlgmr.msra.gmra.mrb[0].mxu0 %v3697_v42 }
  0x9c   :  { %3088 = vmatpush3.bf16.msra.mxu0 %v3666_v12  ;;  %2521 = vmatprep.mubr.msk.f32.mxu0 %vm3580_vm0, %v3581_v1 }
  0x9d   :  { %3089 = vmatprep.subr.bf16.mxu0 %v3579_v0 }
  0xa0   :  { %3091 = vmatpush3.bf16.msra.mxu0 %v3669_v13 }
  0xa1   :  { %3092 = vmatprep.subr.bf16.mxu0 %v3579_v0 }
  0xa4   :  { %3094 = vmatpush3.bf16.msra.mxu0 %v3675_v18 }
  0xa5   :  { %3095 = vmatprep.subr.bf16.mxu0 %v3579_v0 }
  0xa8   :  { %3097 = vmatpush3.bf16.msra.mxu0 %v3686_v32 }
  0xa9   :  { %3098 = vmatprep.subr.bf16.mxu0 %v3579_v0 }
  0xac   :  { %3100 = vmatpush3.bf16.msra.mxu0 %v3702_v44 }
  0xad   :  { %3101 = vmatprep.subr.bf16.mxu0 %v3579_v0 }
  0xb0   :  { %3103 = vmatpush3.bf16.msra.mxu0 %v3713_v49 }
  0xb1   :  { %3104 = vmatprep.subr.bf16.mxu0 %v3579_v0 }
  0xb4   :  { %3106 = vmatpush3.bf16.msra.mxu0 %v3715_v50 }
  0xb5   :  { %3107 = vmatprep.subr.bf16.mxu0 %v3579_v0 }
  0xb8   :  { %3109 = vmatpush3.bf16.msra.mxu0 %v3717_v51 }
  0xb9   :  { %3110 = vmatprep.subr.bf16.mxu0 %v3579_v0 }
  0xbb   :  { %2522 = vmatmul.mubr.f32.vlgmr.msra.gmra.mrb[0].mxu0 %v163_v52 }
  0xbc   :  { %3112 = vmatpush3.bf16.msra.mxu0 %v3771_v27  ;;  %2556 = vmatprep.mubr.msk.f32.mxu0 %vm3580_vm0, %v3581_v1 }
  0xbd   :  { %3113 = vmatprep.subr.bf16.mxu0 %v3579_v0 }
  0xc0   :  { %3115 = vmatpush3.bf16.msra.mxu0 %v3773_v28 }
  0xc1   :  { %3116 = vmatprep.subr.bf16.mxu0 %v3579_v0 }
  0xc4   :  { %3118 = vmatpush3.bf16.msra.mxu0 %v3775_v29 }
  0xc5   :  { %3119 = vmatprep.subr.bf16.mxu0 %v3579_v0 }
  0xc8   :  { %3121 = vmatpush3.bf16.msra.mxu0 %v3778_v30 }
  0xc9   :  { %3122 = vmatprep.subr.bf16.mxu0 %v3579_v0 }
  0xcc   :  { %3124 = vmatpush3.bf16.msra.mxu0 %v3780_v33 }
  0xcd   :  { %3125 = vmatprep.subr.bf16.mxu0 %v3579_v0 }
  0xd0   :  { %3127 = vmatpush3.bf16.msra.mxu0 %v3782_v36 }
  0xd1   :  { %3128 = vmatprep.subr.bf16.mxu0 %v3579_v0 }
  0xd4   :  { %3130 = vmatpush3.bf16.msra.mxu0 %v3784_v37 }
  0xd5   :  { %3131 = vmatprep.subr.bf16.mxu0 %v3579_v0 }
  0xd8   :  { %3133 = vmatpush3.bf16.msra.mxu0 %v3787_v38 }
  0xd9   :  { %3134 = vmatprep.subr.bf16.mxu0 %v3579_v0 }
  0xdb   :  { %2557 = vmatmul.mubr.f32.vlgmr.msra.gmra.mrb[0].mxu0 %v3683_v31 }
  0xdc   :  { %3136 = vmatpush3.bf16.msra.mxu0 %v3666_v12  ;;  %2591 = vmatprep.mubr.msk.f32.mxu0 %vm3580_vm0, %v3581_v1 }
  0xdd   :  { %3137 = vmatprep.subr.bf16.mxu0 %v3579_v0 }
  0xe0   :  { %3139 = vmatpush3.bf16.msra.mxu0 %v3669_v13 }
  0xe1   :  { %3140 = vmatprep.subr.bf16.mxu0 %v3579_v0 }
  0xe4   :  { %3142 = vmatpush3.bf16.msra.mxu0 %v3675_v18 }
  0xe5   :  { %3143 = vmatprep.subr.bf16.mxu0 %v3579_v0 }
  0xe8   :  { %3145 = vmatpush3.bf16.msra.mxu0 %v3686_v32 }
  0xe9   :  { %3146 = vmatprep.subr.bf16.mxu0 %v3579_v0 }
  0xec   :  { %3148 = vmatpush3.bf16.msra.mxu0 %v3702_v44 }
  0xed   :  { %3149 = vmatprep.subr.bf16.mxu0 %v3579_v0 }
  0xf0   :  { %3151 = vmatpush3.bf16.msra.mxu0 %v3713_v49 }
  0xf1   :  { %3152 = vmatprep.subr.bf16.mxu0 %v3579_v0 }
  0xf4   :  { %3154 = vmatpush3.bf16.msra.mxu0 %v3715_v50 }
  0xf5   :  { %3155 = vmatprep.subr.bf16.mxu0 %v3579_v0 }
  0xf8   :  { %3157 = vmatpush3.bf16.msra.mxu0 %v3717_v51 }
  0xf9   :  { %3302 = vmatprep.subr.bf16.mxu0 %v3579_v0 }
  0xfb   :  { %2592 = vmatmul.mubr.f32.vlgmr.msra.gmra.mrb[0].mxu0 %v3683_v31 }
  0xfc   :  { %2836 = vmatprep.mubr.msk.f32.mxu0 %vm3580_vm0, %v3581_v1 }
 0x1ce   :  { %v717_v42 = vpop.f32.mrb[0].mxu0 }
 0x1cf   :  { %v721_v52 = vmul.f32 0.03125, %v717_v42  ;;  %v2593_v55 = vpop.f32.mrb[1].mxu0 }
 0x1d1   :  { %v3954_v59 = vsub.f32 %v3677_v22, %v721_v52 }
 0x1d3   :  { %v723_v61 = vmul.f32 %v3954_v59, %v3954_v59 }
 0x1d5   :  { %v3958_v62 = vand.u32 4294901760, %v723_v61 }
 0x1d7   :  { %v806_v63 = vsub.f32 %v723_v61, %v3958_v62 }
 0x1d9   :  { %v807_v2 = vand.u32 4294901760, %v806_v63 }
 0x1db   :  { %v808_v3 = vsub.f32 %v806_v63, %v807_v2 }
 0x1dd   :  { %v809_v4 = vand.u32 4294901760, %v808_v3 }
 0x1df   :  { %2627 = vmatmul.mubr.f32.vlgmr.msra.gmra.mrb[0].mxu1 %v809_v4 }
 0x1e0   :  { %3184 = vmatpush3.bf16.msra.mxu1 %v3793_v41  ;;  %2661 = vmatprep.mubr.msk.f32.mxu1 %vm3580_vm0, %v3581_v1 }
 0x1e1   :  { %3185 = vmatprep.subr.bf16.mxu1 %v3579_v0 }
 0x1e4   :  { %3187 = vmatpush3.bf16.msra.mxu1 %v3801_v57 }
 0x1e5   :  { %3188 = vmatprep.subr.bf16.mxu1 %v3579_v0 }
 0x1e8   :  { %3190 = vmatpush3.bf16.msra.mxu1 %v3808_v8 }
 0x1e9   :  { %3191 = vmatprep.subr.bf16.mxu1 %v3579_v0 }
 0x1ec   :  { %3193 = vmatpush3.bf16.msra.mxu1 %v3815_v16 }
 0x1ed   :  { %3194 = vmatprep.subr.bf16.mxu1 %v3579_v0 }
 0x1f0   :  { %3196 = vmatpush3.bf16.msra.mxu1 %v3821_v17 }
 0x1f1   :  { %3197 = vmatprep.subr.bf16.mxu1 %v3579_v0 }
 0x1f4   :  { %3199 = vmatpush3.bf16.msra.mxu1 %v3827_v58 }
 0x1f5   :  { %3200 = vmatprep.subr.bf16.mxu1 %v3579_v0 }
 0x1f8   :  { %3202 = vmatpush3.bf16.msra.mxu1 %v3832_v6 }
 0x1f9   :  { %3203 = vmatprep.subr.bf16.mxu1 %v3579_v0 }
 0x1fc   :  { %3205 = vmatpush3.bf16.msra.mxu1 %v3836_v25  ;;  %v4131_v25 = vld [vmem:[#allocation7 + $0x48] sm:$0xff] }
 0x1fd   :  { %3206 = vmatprep.subr.bf16.mxu1 %v3579_v0 }
 0x1ff   :  { %2662 = vmatmul.mubr.f32.vlgmr.msra.gmra.mrb[0].mxu1 %v3958_v62 }
 0x200   :  { %3208 = vmatpush3.bf16.msra.mxu1 %v3842_v26  ;;  %2696 = vmatprep.mubr.msk.f32.mxu1 %vm3580_vm0, %v3581_v1  ;;  %v1552_v26 = vand.u32 4294901760, %v4116_v60 }
 0x201   :  { %3209 = vmatprep.subr.bf16.mxu1 %v3579_v0 }
 0x204   :  { %3211 = vmatpush3.bf16.msra.mxu1 %v3849_v10  ;;  %v1559_v10 = vand.u32 4294901760, %v4121_v23 }
 0x205   :  { %3212 = vmatprep.subr.bf16.mxu1 %v3579_v0 }
 0x206   :  { %v1560_v42 = vsub.f32 %v4121_v23, %v1559_v10 }
 0x208   :  { %3214 = vmatpush3.bf16.msra.mxu1 %v3857_v34  ;;  %v1441_v34 = vand.u32 4294901760, %v4129_v24  ;;  %v1561_v3 = vand.u32 4294901760, %v1560_v42  ;;  %v1407_v42 = vld [vmem:[#allocation7 + $0x70] sm:$0xff] }
 0x209   :  { %3215 = vmatprep.subr.bf16.mxu1 %v3579_v0 }
 0x20a   :  { %v4149_v52 = vsub.f32 %v4129_v24, %v1441_v34 }
 0x20c   :  { %3217 = vmatpush3.bf16.msra.mxu1 %v3863_v35  ;;  %v1444_v35 = vand.u32 4294901760, %v4131_v25  ;;  %v1566_v4 = vand.u32 4294901760, %v4149_v52 }
 0x20d   :  { %3218 = vmatprep.subr.bf16.mxu1 %v3579_v0 }
 0x20e   :  { %v4154_v61 = vsub.f32 %v4131_v25, %v1444_v35 }
 0x210   :  { %3220 = vmatpush3.bf16.msra.mxu1 %v3869_v43 }
 0x211   :  { %3221 = vmatprep.subr.bf16.mxu1 %v3579_v0 }
 0x214   :  { %3223 = vmatpush3.bf16.msra.mxu1 %v3875_v47 }
 0x215   :  { %3224 = vmatprep.subr.bf16.mxu1 %v3579_v0 }
 0x218   :  { %3226 = vmatpush3.bf16.msra.mxu1 %v3881_v48 }
 0x219   :  { %3227 = vmatprep.subr.bf16.mxu1 %v3579_v0 }
 0x21c   :  { %3229 = vmatpush3.bf16.msra.mxu1 %v3887_v54  ;;  %v1553_v54 = vsub.f32 %v4116_v60, %v1552_v26 }
 0x21d   :  { %3230 = vmatprep.subr.bf16.mxu1 %v3579_v0 }
 0x21f   :  { %2697 = vmatmul.mubr.f32.vlgmr.msra.gmra.mrb[0].mxu1 %v806_v63  ;;  %v4158_v63 = vld [vmem:[#allocation7 + $0x58] sm:$0xff] }
 0x220   :  { %3232 = vmatpush3.bf16.msra.mxu1 %v3666_v12  ;;  %2731 = vmatprep.mubr.msk.f32.mxu1 %vm3580_vm0, %v3581_v1 }
 0x221   :  { %3233 = vmatprep.subr.bf16.mxu1 %v3579_v0 }
 0x224   :  { %3235 = vmatpush3.bf16.msra.mxu1 %v3669_v13 }
 0x225   :  { %3236 = vmatprep.subr.bf16.mxu1 %v3579_v0 }
 0x228   :  { %3238 = vmatpush3.bf16.msra.mxu1 %v3675_v18 }
 0x229   :  { %3239 = vmatprep.subr.bf16.mxu1 %v3579_v0 }
 0x22c   :  { %3241 = vmatpush3.bf16.msra.mxu1 %v3686_v32 }
 0x22d   :  { %3242 = vmatprep.subr.bf16.mxu1 %v3579_v0 }
 0x230   :  { %3244 = vmatpush3.bf16.msra.mxu1 %v3702_v44 }
 0x231   :  { %3245 = vmatprep.subr.bf16.mxu1 %v3579_v0 }
 0x234   :  { %3247 = vmatpush3.bf16.msra.mxu1 %v3713_v49 }
 0x235   :  { %3248 = vmatprep.subr.bf16.mxu1 %v3579_v0 }
 0x238   :  { %3250 = vmatpush3.bf16.msra.mxu1 %v3715_v50 }
 0x239   :  { %3251 = vmatprep.subr.bf16.mxu1 %v3579_v0 }
 0x23c   :  { %3253 = vmatpush3.bf16.msra.mxu1 %v3717_v51 }
 0x23d   :  { %3254 = vmatprep.subr.bf16.mxu1 %v3579_v0 }
 0x23f   :  { %2732 = vmatmul.mubr.f32.vlgmr.msra.gmra.mrb[0].mxu1 %v807_v2  ;;  %v1554_v2 = vand.u32 4294901760, %v1553_v54 }
 0x240   :  { %3256 = vmatpush3.bf16.msra.mxu1 %v3771_v27  ;;  %2766 = vmatprep.mubr.msk.f32.mxu1 %vm3580_vm0, %v3581_v1 }
 0x241   :  { %3257 = vmatprep.subr.bf16.mxu1 %v3579_v0 }
 0x244   :  { %3259 = vmatpush3.bf16.msra.mxu1 %v3773_v28 }
 0x245   :  { %3260 = vmatprep.subr.bf16.mxu1 %v3579_v0 }
 0x248   :  { %3262 = vmatpush3.bf16.msra.mxu1 %v3775_v29 }
 0x249   :  { %3263 = vmatprep.subr.bf16.mxu1 %v3579_v0 }
 0x24c   :  { %3265 = vmatpush3.bf16.msra.mxu1 %v3778_v30 }
 0x24d   :  { %3266 = vmatprep.subr.bf16.mxu1 %v3579_v0 }
 0x250   :  { %3268 = vmatpush3.bf16.msra.mxu1 %v3780_v33  ;;  %v4080_v33 = vld [vmem:[#allocation7 + $0x20] sm:$0xff] }
 0x251   :  { %3269 = vmatprep.subr.bf16.mxu1 %v3579_v0  ;;  %v1429_v8 = vand.u32 4294901760, %v4080_v33 }
 0x253   :  { %v4097_v39 = vsub.f32 %v4080_v33, %v1429_v8  ;;  %v4207_v33 = vpack.c.bf16 %v1438_v20, %v1435_v53 }
 0x254   :  { %3271 = vmatpush3.bf16.msra.mxu1 %v3782_v36  ;;  %v4082_v36 = vld [vmem:[#allocation7 + $0x28] sm:$0xff] }
 0x255   :  { %3272 = vmatprep.subr.bf16.mxu1 %v3579_v0  ;;  %v1432_v11 = vand.u32 4294901760, %v4082_v36  ;;  %v1538_v56 = vand.u32 4294901760, %v4097_v39 }
 0x257   :  { %v4102_v40 = vsub.f32 %v4082_v36, %v1432_v11  ;;  %v1539_v6 = vsub.f32 %v4097_v39, %v1538_v56 }
 0x258   :  { %3274 = vmatpush3.bf16.msra.mxu1 %v3784_v37 }
 0x259   :  { %3275 = vmatprep.subr.bf16.mxu1 %v3579_v0  ;;  %v1545_v58 = vand.u32 4294901760, %v4102_v40  ;;  %v1540_v43 = vand.u32 4294901760, %v1539_v6 }
 0x25b   :  { %v1546_v7 = vsub.f32 %v4102_v40, %v1545_v58 }
 0x25c   :  { %3277 = vmatpush3.bf16.msra.mxu1 %v3787_v38 }
 0x25d   :  { %3278 = vmatprep.subr.bf16.mxu1 %v3579_v0  ;;  %v1547_v47 = vand.u32 4294901760, %v1546_v7 }
 0x25f   :  { %2767 = vmatmul.mubr.f32.vlgmr.msra.gmra.mrb[0].mxu1 %v3958_v62  ;;  %v3333_v55 = vpack.c.bf16 %v1547_v47, %v1540_v43 }
 0x260   :  { %3280 = vmatpush3.bf16.msra.mxu1 %v3666_v12  ;;  %2801 = vmatprep.mubr.msk.f32.mxu1 %vm3580_vm0, %v3581_v1  ;;  %v1393_v12 = vld [vmem:[#allocation7] sm:$0xff] }
 0x261   :  { %3281 = vmatprep.subr.bf16.mxu1 %v3579_v0 }
 0x264   :  { %3283 = vmatpush3.bf16.msra.mxu1 %v3669_v13  ;;  %v1394_v13 = vld [vmem:[#allocation7 + $0x8] sm:$0xff] }
 0x265   :  { %3284 = vmatprep.subr.bf16.mxu1 %v3579_v0  ;;  %v1420_v22 = vand.u32 4294901760, %v1394_v13 }
 0x268   :  { %3286 = vmatpush3.bf16.msra.mxu1 %v3675_v18  ;;  %v1417_v18 = vand.u32 4294901760, %v1393_v12 }
 0x269   :  { %3287 = vmatprep.subr.bf16.mxu1 %v3579_v0 }
 0x26a   :  { %v4056_v31 = vsub.f32 %v1393_v12, %v1417_v18  ;;  %v4138_v48 = vpack.c.bf16 %v1420_v22, %v1417_v18  ;;  %v1450_v18 = vand.u32 4294901760, %v4158_v63 }
 0x26c   :  { %3289 = vmatpush3.bf16.msra.mxu1 %v3686_v32  ;;  %v4058_v32 = vsub.f32 %v1394_v13, %v1420_v22  ;;  %3304 = vmatpush3.bf16.msra.mxu0 %v4138_v48  ;;  %v1573_v13 = vand.u32 4294901760, %v4154_v61 }
 0x26d   :  { %3290 = vmatprep.subr.bf16.mxu1 %v3579_v0  ;;  %3305 = vmatprep.subr.bf16.mxu0 %v3579_v0 }
 0x270   :  { %3292 = vmatpush3.bf16.msra.mxu1 %v3702_v44  ;;  %v4060_v44 = vld [vmem:[#allocation7 + $0x10] sm:$0xff] }
 0x271   :  { %3293 = vmatprep.subr.bf16.mxu1 %v3579_v0  ;;  %v1423_v5 = vand.u32 4294901760, %v4060_v44 }
 0x273   :  { %v4075_v29 = vsub.f32 %v4060_v44, %v1423_v5  ;;  %v3336_v44 = vpack.c.bf16 %v1561_v3, %v1554_v2 }
 0x274   :  { %3295 = vmatpush3.bf16.msra.mxu1 %v3713_v49  ;;  %v4062_v49 = vld [vmem:[#allocation7 + $0x18] sm:$0xff] }
 0x275   :  { %3296 = vmatprep.subr.bf16.mxu1 %v3579_v0  ;;  %v1426_v9 = vand.u32 4294901760, %v4062_v49  ;;  %v1524_v41 = vand.u32 4294901760, %v4075_v29 }
 0x277   :  { %v4078_v30 = vsub.f32 %v4062_v49, %v1426_v9  ;;  %v1525_v15 = vsub.f32 %v4075_v29, %v1524_v41  ;;  %v4167_v22 = vpack.c.bf16 %v1426_v9, %v1423_v5  ;;  %v1567_v49 = vsub.f32 %v4149_v52, %v1566_v4 }
 0x278   :  { %3298 = vmatpush3.bf16.msra.mxu1 %v3715_v50  ;;  %v1510_v50 = vand.u32 4294901760, %v4056_v31 }
 0x279   :  { %3299 = vmatprep.subr.bf16.mxu1 %v3579_v0  ;;  %v1531_v57 = vand.u32 4294901760, %v4078_v30  ;;  %v1526_v17 = vand.u32 4294901760, %v1525_v15  ;;  %3307 = vmatpush3.bf16.msra.mxu0 %v4167_v22  ;;  %v1568_v5 = vand.u32 4294901760, %v1567_v49 }
 0x27a   :  { %v1511_v27 = vsub.f32 %v4056_v31, %v1510_v50  ;;  %3308 = vmatprep.subr.bf16.mxu0 %v3579_v0 }
 0x27b   :  { %v1532_v16 = vsub.f32 %v4078_v30, %v1531_v57 }
 0x27c   :  { %3301 = vmatpush3.bf16.msra.mxu1 %v3717_v51  ;;  %v1517_v51 = vand.u32 4294901760, %v4058_v32  ;;  %v1512_v37 = vand.u32 4294901760, %v1511_v27 }
 0x27d   :  { %3326 = vmatprep.subr.bf16.mxu1 %v3579_v0  ;;  %v1533_v19 = vand.u32 4294901760, %v1532_v16 }
 0x27e   :  { %v1518_v28 = vsub.f32 %v4058_v32, %v1517_v51 }
 0x27f   :  { %2802 = vmatmul.mubr.f32.vlgmr.msra.gmra.mrb[0].mxu1 %v3958_v62  ;;  %v3330_v21 = vpack.c.bf16 %v1533_v19, %v1526_v17  ;;  %v4156_v62 = vld [vmem:[#allocation7 + $0x50] sm:$0xff] }
 0x280   :  { %2871 = vmatprep.mubr.msk.f32.mxu1 %vm3580_vm0, %v3581_v1  ;;  %v1519_v38 = vand.u32 4294901760, %v1518_v28  ;;  %v1447_v12 = vand.u32 4294901760, %v4156_v62  ;;  %v1574_v28 = vsub.f32 %v4154_v61, %v1573_v13 }
 0x282   :  { %v3327_v14 = vpack.c.bf16 %v1519_v38, %v1512_v37  ;;  %v4173_v27 = vsub.f32 %v4156_v62, %v1447_v12  ;;  %v4179_v37 = vsub.f32 %v4158_v63, %v1450_v18  ;;  %v1405_v38 = vld [vmem:[#allocation7 + $0x60] sm:$0xff]  ;;  %v1575_v17 = vand.u32 4294901760, %v1574_v28 }
 0x283   :  { %v1453_v15 = vand.u32 4294901760, %v1405_v38  ;;  %v1459_v63 = vand.u32 4294901760, %v1407_v42 }
 0x284   :  { %3328 = vmatpush3.bf16.msra.mxu1 %v3327_v14  ;;  %v1406_v14 = vld [vmem:[#allocation7 + $0x68] sm:$0xff]  ;;  %v1580_v9 = vand.u32 4294901760, %v4173_v27  ;;  %v1587_v19 = vand.u32 4294901760, %v4179_v37  ;;  %v3339_v47 = vpack.c.bf16 %v1575_v17, %v1568_v5 }
 0x285   :  { %3329 = vmatprep.subr.bf16.mxu1 %v3579_v0  ;;  %v1456_v16 = vand.u32 4294901760, %v1406_v14  ;;  %v4195_v7 = vsub.f32 %v1405_v38, %v1453_v15  ;;  %v4219_v20 = vsub.f32 %v1407_v42, %v1459_v63  ;;  %v3363_v42 = vpack.c.bf16 %v4154_v61, %v4149_v52 }
 0x286   :  { %v1581_v6 = vsub.f32 %v4173_v27, %v1580_v9  ;;  %v1588_v54 = vsub.f32 %v4179_v37, %v1587_v19 }
 0x287   :  { %v4197_v43 = vsub.f32 %v1406_v14, %v1456_v16  ;;  %v1608_v38 = vand.u32 4294901760, %v4219_v20 }
 0x288   :  { %3331 = vmatpush3.bf16.msra.mxu1 %v3330_v21  ;;  %v4190_v21 = vpack.c.bf16 %v1432_v11, %v1429_v8  ;;  %v1582_v36 = vand.u32 4294901760, %v1581_v6  ;;  %v1594_v8 = vand.u32 4294901760, %v4195_v7  ;;  %v1589_v62 = vand.u32 4294901760, %v1588_v54 }
 0x289   :  { %3332 = vmatprep.subr.bf16.mxu1 %v3579_v0  ;;  %v1601_v11 = vand.u32 4294901760, %v4197_v43  ;;  %v1609_v24 = vsub.f32 %v4219_v20, %v1608_v38  ;;  %v3360_v54 = vpack.c.bf16 %v4121_v23, %v4116_v60 }
 0x28a   :  { %3310 = vmatpush3.bf16.msra.mxu0 %v4190_v21  ;;  %v1595_v45 = vsub.f32 %v4195_v7, %v1594_v8  ;;  %v3342_v53 = vpack.c.bf16 %v1589_v62, %v1582_v36  ;;  %v3369_v36 = vpack.c.bf16 %v4197_v43, %v4195_v7 }
 0x28b   :  { %3311 = vmatprep.subr.bf16.mxu0 %v3579_v0  ;;  %v1602_v46 = vsub.f32 %v4197_v43, %v1601_v11 }
 0x28c   :  { %3334 = vmatpush3.bf16.msra.mxu1 %v3333_v55  ;;  %v1408_v55 = vld [vmem:[#allocation7 + $0x78] sm:$0xff]  ;;  %v1596_v49 = vand.u32 4294901760, %v1595_v45 }
 0x28d   :  { %3335 = vmatprep.subr.bf16.mxu1 %v3579_v0  ;;  %v1462_v2 = vand.u32 4294901760, %v1408_v55  ;;  %v1603_v28 = vand.u32 4294901760, %v1602_v46 }
 0x28e   :  { %3313 = vmatpush3.bf16.msra.mxu0 %v4207_v33 }
 0x28f   :  { %v4221_v3 = vsub.f32 %v1408_v55, %v1462_v2  ;;  %3314 = vmatprep.subr.bf16.mxu0 %v3579_v0  ;;  %v3345_v5 = vpack.c.bf16 %v1603_v28, %v1596_v49  ;;  %v3366_v55 = vpack.c.bf16 %v4179_v37, %v4173_v27 }
 0x290   :  { %3337 = vmatpush3.bf16.msra.mxu1 %v3336_v44  ;;  %v4228_v44 = vpack.c.bf16 %v1444_v35, %v1441_v34  ;;  %v4241_v34 = vpack.c.bf16 %v1450_v18, %v1447_v12  ;;  %v1610_v35 = vand.u32 4294901760, %v1609_v24  ;;  %v4252_v12 = vpack.c.bf16 %v1462_v2, %v1459_v63 }
 0x291   :  { %3338 = vmatprep.subr.bf16.mxu1 %v3579_v0  ;;  %v1615_v14 = vand.u32 4294901760, %v4221_v3  ;;  %v3351_v18 = vpack.c.bf16 %v4058_v32, %v4056_v31  ;;  %v3372_v62 = vpack.c.bf16 %v4221_v3, %v4219_v20  ;;  %v3405_v31 = vpack.c.bf16 %v1545_v58, %v1538_v56 }
 0x292   :  { %3316 = vmatpush3.bf16.msra.mxu0 %v4228_v44  ;;  %v3411_v32 = vpack.c.bf16 %v1573_v13, %v1566_v4 }
 0x293   :  { %v1616_v25 = vsub.f32 %v4221_v3, %v1615_v14  ;;  %3317 = vmatprep.subr.bf16.mxu0 %v3579_v0 }
 0x294   :  { %3340 = vmatpush3.bf16.msra.mxu1 %v3339_v47  ;;  %v4246_v47 = vpack.c.bf16 %v1456_v16, %v1453_v15  ;;  %v3354_v15 = vpack.c.bf16 %v4078_v30, %v4075_v29  ;;  %v3357_v16 = vpack.c.bf16 %v4102_v40, %v4097_v39  ;;  %v3420_v29 = vpack.c.bf16 %v1615_v14, %v1608_v38 }
 0x295   :  { %3341 = vmatprep.subr.bf16.mxu1 %v3579_v0  ;;  %v1617_v17 = vand.u32 4294901760, %v1616_v25  ;;  %v2075_v25 = vld [vmem:[%s4393_s4] ss:$0 sm:$0xff] }
 0x296   :  { %3319 = vmatpush3.bf16.msra.mxu0 %v4241_v34 }
 0x297   :  { %v3348_v6 = vpack.c.bf16 %v1617_v17, %v1610_v35  ;;  %3320 = vmatprep.subr.bf16.mxu0 %v3579_v0  ;;  %v1383_v35 = vmul.f32 %v2075_v25, %v3954_v59 }
 0x298   :  { %3343 = vmatpush3.bf16.msra.mxu1 %v3342_v53 }
 0x299   :  { %3344 = vmatprep.subr.bf16.mxu1 %v3579_v0 }
 0x29a   :  { %3322 = vmatpush3.bf16.msra.mxu0 %v4246_v47 }
 0x29b   :  { %3323 = vmatprep.subr.bf16.mxu0 %v3579_v0 }
 0x29c   :  { %3346 = vmatpush3.bf16.msra.mxu1 %v3345_v5 }
 0x29d   :  { %3347 = vmatprep.subr.bf16.mxu1 %v3579_v0 }
 0x29e   :  { %3325 = vmatpush3.bf16.msra.mxu0 %v4252_v12 }
 0x29f   :  { %3350 = vmatprep.subr.bf16.mxu0 %v3579_v0 }
 0x2a0   :  { %3349 = vmatpush3.bf16.msra.mxu1 %v3348_v6  ;;  %v2076_v6 = vld [vmem:[%s4394_s5] ss:$0 sm:$0xff] }
 0x2a1   :  { %3374 = vmatprep.subr.bf16.mxu1 %v3579_v0 }
 0x352   :  { %v1361_v63 = vpop.f32.mrb[0].mxu1 }
 0x353   :  { %v1365_v2 = vmul.f32 0.032258064, %v1361_v63  ;;  %v2803_v45 = vpop.f32.mrb[1].mxu1 }
 0x355   :  { %3475 = vrsqrt.f32 %v1365_v2  ;;  %vm1368_vm1 = vcmp.eq.f32.partialorder %v1365_v2, inf  ;;  %v1371_v49 = vand.u32 2147483648, %v1365_v2  ;;  %vm1370_vm2 = vcmp.eq.f32.partialorder %v1365_v2, 0.0 }
 0x35f   :  { %v3476_v46 = vpop.eup %3475 }
 0x360   :  { %v1367_v53 = vmul.f32 %v3476_v46, %v1365_v2 }
 0x362   :  { %v1369_v28 = vsel %vm1368_vm1, %v1365_v2, %v1367_v53 }
 0x363   :  { %v1372_v5 = vsel %vm1370_vm2, %v1371_v49, %v1369_v28 }
 0x364   :  { %v1373_v24 = vadd.f32 1e-06, %v1372_v5 }
 0x366   :  { %3477 = vrcp.f32 %v1373_v24 }
 0x370   :  { %v3478_v17 = vpop.eup %3477 }
 0x371   :  { %v1384_v63 = vmul.f32 %v3478_v17, %v1383_v35 }
 0x373   :  { %v1392_v45 = vadd.f32 %v2076_v6, %v1384_v63 }
 0x375   :  { %v4279_v46 = vand.u32 4294901760, %v1392_v45 }
 0x377   :  { %v1498_v2 = vsub.f32 %v1392_v45, %v4279_v46  ;;  %2872 = vmatmul.mubr.f32.vlgmr.msra.gmra.mrb[2].mxu1 %v4279_v46 }
 0x378   :  { %3376 = vmatpush3.bf16.msra.mxu1 %v4138_v48  ;;  %2941 = vmatprep.mubr.msk.f32.mxu1 %vm3580_vm0, %v3581_v1 }
 0x379   :  { %3377 = vmatprep.subr.bf16.mxu1 %v3579_v0  ;;  %v1499_v59 = vand.u32 4294901760, %v1498_v2 }
 0x37b   :  { %v1500_v53 = vsub.f32 %v1498_v2, %v1499_v59 }
 0x37c   :  { %3379 = vmatpush3.bf16.msra.mxu1 %v4167_v22 }
 0x37d   :  { %3380 = vmatprep.subr.bf16.mxu1 %v3579_v0  ;;  %v1501_v49 = vand.u32 4294901760, %v1500_v53 }
 0x37f   :  { %2837 = vmatmul.mubr.f32.vlgmr.msra.gmra.mrb[2].mxu0 %v1501_v49 }
 0x380   :  { %3352 = vmatpush3.bf16.msra.mxu0 %v3351_v18  ;;  %3382 = vmatpush3.bf16.msra.mxu1 %v4190_v21  ;;  %v3399_v18 = vpack.c.bf16 %v1517_v51, %v1510_v50  ;;  %v3414_v50 = vpack.c.bf16 %v1587_v19, %v1580_v9  ;;  %v3417_v51 = vpack.c.bf16 %v1601_v11, %v1594_v8  ;;  %v3479_v9 = vld [vmem:[#allocation2] sm:$0xf] }
 0x381   :  { %3353 = vmatprep.subr.bf16.mxu0 %v3579_v0  ;;  %3383 = vmatprep.subr.bf16.mxu1 %v3579_v0 }
 0x382   :  { %2906 = vmatprep.mubr.msk.f32.mxu0 %vm3580_vm0, %v3581_v1 }
 0x384   :  { %3355 = vmatpush3.bf16.msra.mxu0 %v3354_v15  ;;  %3385 = vmatpush3.bf16.msra.mxu1 %v4207_v33 }
 0x385   :  { %3356 = vmatprep.subr.bf16.mxu0 %v3579_v0  ;;  %3386 = vmatprep.subr.bf16.mxu1 %v3579_v0 }
 0x388   :  { %3358 = vmatpush3.bf16.msra.mxu0 %v3357_v16  ;;  %3388 = vmatpush3.bf16.msra.mxu1 %v4228_v44 }
 0x389   :  { %3359 = vmatprep.subr.bf16.mxu0 %v3579_v0  ;;  %3389 = vmatprep.subr.bf16.mxu1 %v3579_v0 }
 0x38c   :  { %3361 = vmatpush3.bf16.msra.mxu0 %v3360_v54  ;;  %3391 = vmatpush3.bf16.msra.mxu1 %v4241_v34 }
 0x38d   :  { %3362 = vmatprep.subr.bf16.mxu0 %v3579_v0  ;;  %3392 = vmatprep.subr.bf16.mxu1 %v3579_v0 }
 0x390   :  { %3364 = vmatpush3.bf16.msra.mxu0 %v3363_v42  ;;  %3394 = vmatpush3.bf16.msra.mxu1 %v4246_v47 }
 0x391   :  { %3365 = vmatprep.subr.bf16.mxu0 %v3579_v0  ;;  %3395 = vmatprep.subr.bf16.mxu1 %v3579_v0 }
 0x394   :  { %3367 = vmatpush3.bf16.msra.mxu0 %v3366_v55  ;;  %3397 = vmatpush3.bf16.msra.mxu1 %v4252_v12 }
 0x395   :  { %3368 = vmatprep.subr.bf16.mxu0 %v3579_v0  ;;  %3422 = vmatprep.subr.bf16.mxu1 %v3579_v0 }
 0x397   :  { %2942 = vmatmul.mubr.f32.vlgmr.msra.gmra.mrb[4].mxu1 %v1499_v59 }
 0x398   :  { %3370 = vmatpush3.bf16.msra.mxu0 %v3369_v36  ;;  %3424 = vmatpush3.bf16.msra.mxu1 %v4138_v48  ;;  %v3402_v48 = vpack.c.bf16 %v1531_v57, %v1524_v41  ;;  %v2077_v57 = vld [vmem:[%s4392_s3] ss:$0 sm:$0xff]  ;;  %s3546_s3 = scalar_lea.vmem %s2066_s13, 64 }
 0x399   :  { %3371 = vmatprep.subr.bf16.mxu0 %v3579_v0  ;;  %3425 = vmatprep.subr.bf16.mxu1 %v3579_v0  ;;  %p3547_p10 = scmp.ne.s32.totalorder %s2066_s13, %s3546_s3  ;;  %p3552_p12 = scmp.lt.s32.totalorder %s3546_s3, %s3546_s3 }
 0x39a   :  { %3011 = vmatprep.mubr.msk.f32.mxu1 %vm3580_vm0, %v3581_v1 }
 0x39b   :  { %p3553_p13 = por %p3552_p12, %p3551_p11 }
 0x39c   :  { %3373 = vmatpush3.bf16.msra.mxu0 %v3372_v62  ;;  %3427 = vmatpush3.bf16.msra.mxu1 %v4167_v22 }
 0x39d   :  { %3398 = vmatprep.subr.bf16.mxu0 %v3579_v0  ;;  %3428 = vmatprep.subr.bf16.mxu1 %v3579_v0  ;;  %p3554_p0 = pnand %p3553_p13, %p3547_p10 }
 0x39f   :  { %2907 = vmatmul.mubr.f32.vlgmr.msra.gmra.mrb[4].mxu0 %v1498_v2 }
 0x3a0   :  { %3400 = vmatpush3.bf16.msra.mxu0 %v3399_v18  ;;  %3430 = vmatpush3.bf16.msra.mxu1 %v4190_v21 }
 0x3a1   :  { %3401 = vmatprep.subr.bf16.mxu0 %v3579_v0  ;;  %3431 = vmatprep.subr.bf16.mxu1 %v3579_v0 }
 0x3a2   :  { %2976 = vmatprep.mubr.msk.f32.mxu0 %vm3580_vm0, %v3581_v1  ;;  %v3408_v1 = vpack.c.bf16 %v1559_v10, %v1552_v26 }
 0x3a4   :  { %3403 = vmatpush3.bf16.msra.mxu0 %v3402_v48  ;;  %3433 = vmatpush3.bf16.msra.mxu1 %v4207_v33 }
 0x3a5   :  { %3404 = vmatprep.subr.bf16.mxu0 %v3579_v0  ;;  %3434 = vmatprep.subr.bf16.mxu1 %v3579_v0 }
 0x3a8   :  { %3406 = vmatpush3.bf16.msra.mxu0 %v3405_v31  ;;  %3436 = vmatpush3.bf16.msra.mxu1 %v4228_v44 }
 0x3a9   :  { %3407 = vmatprep.subr.bf16.mxu0 %v3579_v0  ;;  %3437 = vmatprep.subr.bf16.mxu1 %v3579_v0 }
 0x3ac   :  { %3409 = vmatpush3.bf16.msra.mxu0 %v3408_v1  ;;  %3439 = vmatpush3.bf16.msra.mxu1 %v4241_v34 }
 0x3ad   :  { %3410 = vmatprep.subr.bf16.mxu0 %v3579_v0  ;;  %3440 = vmatprep.subr.bf16.mxu1 %v3579_v0 }
 0x3b0   :  { %3412 = vmatpush3.bf16.msra.mxu0 %v3411_v32  ;;  %3442 = vmatpush3.bf16.msra.mxu1 %v4246_v47 }
 0x3b1   :  { %3413 = vmatprep.subr.bf16.mxu0 %v3579_v0  ;;  %3443 = vmatprep.subr.bf16.mxu1 %v3579_v0 }
 0x3b4   :  { %3415 = vmatpush3.bf16.msra.mxu0 %v3414_v50  ;;  %3445 = vmatpush3.bf16.msra.mxu1 %v4252_v12 }
 0x3b5   :  { %3416 = vmatprep.subr.bf16.mxu0 %v3579_v0 }
 0x3b7   :  { %3012 = vmatmul.mubr.f32.vlgmr.msra.gmra.mrb[6].mxu1 %v4279_v46 }
 0x3b8   :  { %3418 = vmatpush3.bf16.msra.mxu0 %v3417_v51 }
 0x3b9   :  { %3419 = vmatprep.subr.bf16.mxu0 %v3579_v0 }
 0x3bc   :  { %3421 = vmatpush3.bf16.msra.mxu0 %v3420_v29 }
 0x3bf   :  { %2977 = vmatmul.mubr.f32.vlgmr.msra.gmra.mrb[6].mxu0 %v4279_v46 }
 0x44a   :  { %v1654_v30 = vpop.f32.mrb[2].mxu1 }
 0x44b   :  { %v2873_v41 = vpop.f32.mrb[3].mxu1 }
 0x452   :  { %v1503_v39 = vpop.f32.mrb[2].mxu0 }
 0x453   :  { %v1504_v40 = vadd.f32 %v2077_v57, %v1503_v39  ;;  %v2838_v56 = vpop.f32.mrb[3].mxu0 }
 0x455   :  { %v1655_v58 = vadd.f32 %v1654_v30, %v1504_v40 }
 0x46a   :  { %v1847_v60 = vpop.f32.mrb[4].mxu1 }
 0x46b   :  { %v2943_v23 = vpop.f32.mrb[5].mxu1 }
 0x472   :  { %v1758_v26 = vpop.f32.mrb[4].mxu0 }
 0x473   :  { %v1759_v10 = vadd.f32 %v1758_v26, %v1655_v58  ;;  %v2908_v52 = vpop.f32.mrb[5].mxu0 }
 0x475   :  { %v1848_v61 = vadd.f32 %v1847_v60, %v1759_v10 }
 0x48a   :  { %v2053_v0 = vpop.f32.mrb[6].mxu1 }
 0x48b   :  { %v3013_v4 = vpop.f32.mrb[7].mxu1 }
 0x492   :  { %v1966_v13 = vpop.f32.mrb[6].mxu0 }
 0x493   :  { %v1967_v22 = vadd.f32 %v1966_v13, %v1848_v61  ;;  %v2978_v27 = vpop.f32.mrb[7].mxu0 }
 0x495   :  { %v2054_v37 = vadd.f32 %v2053_v0, %v1967_v22 }
 0x497   :  { %v2057_v19 = vadd.f32 %v3479_v9, %v2054_v37 }
 0x499   :  { %2058 = vst [vmem:[#allocation8] sm:$0xf] %v2057_v19 }
 0x49a   :  { %3557 = shalt.err (!%p3554_p0)
}
 0x49b   :  { %s3558_s16 = scalar_lea.hbm %s4395_s6, 64 }
 0x49c   :  { %p3559_p1 = scmp.ne.s32.totalorder %s4395_s6, %s3558_s16  ;;  %p3562_p2 = scmp.lt.u32.totalorder %s3558_s16, %s4395_s6 }
 0x49e   :  { %p3564_p3 = pnand %p3562_p2, %p3559_p1 }
 0x4a0   :  { %3567 = shalt.err (!%p3564_p3)
}
 0x4a1   :  { %2068 = dma.vmem_to_hbm [thread:$0]  %s2066_s13, 64, %s4395_s6, [#allocation4]  }
 0x4a2   :  { %3572 = dma.done.wait [#allocation4], 64  }
 0x4a3   :  { %3573 = vsyncadd [#allocation4], 4294967232 }
 0x4a4   :  { %2072 = vsyncpa [#allocation3], 1 }
 0x4a5   :  { %2073 = vsyncpa [#allocation6], 1 }
 0x4a6   :  { %2074 = vsyncpa [#allocation4], 1 }

</bundles_post_ra>
